<compile_context>
chip_gen: v7x
topology: tpu7x:2x2x1
jax: 0.10.0
libtpu: 0.0.40
codegen_flags: <defaults>
</compile_context>

<pallas_src>
import jax
import jax.numpy as jnp
from jax.experimental import pallas as pl
from jax.experimental.pallas import tpu as pltpu

LANE = 128
SUBLANE = 8


def _round_up(x, m):
    return (x + m - 1) // m * m


def _cdiv(a, b):
    return (a + b - 1) // b


def albert_classifier_kernel(cls_ids_ref,   # SMEM [Bp]      int32  (scalar prefetch)
                             hid_hbm,       # HBM  [V, H]    f32    (memory_space=pl.ANY)
                             wp_ref,        # VMEM [H, H]    bf16   resident
                             bp_ref,        # VMEM [1, H]    f32    resident
                             w12_ref,       # VMEM [H, Cp]   bf16   resident (fc1@fc2 fold)
                             b12_ref,       # VMEM [1, Cp]   f32    resident
                             out_ref,       # VMEM [tm, Cp]  f32    lane-dense logits
                             x_buf,         # VMEM [tm, H]   f32    gathered CLS rows
                             sems):         # DMA semaphores [tm]
    tm = x_buf.shape[0]
    base = pl.program_id(0) * tm

    # Fused CLS gather: one small HBM->VMEM DMA per row.  All copies are
    # issued before any wait so they overlap in flight.
    copies = []
    for r in range(tm):                                   # tm is static -> unrolled
        row = cls_ids_ref[base + r]
        cp = pltpu.make_async_copy(hid_hbm.at[pl.ds(row, 1), :],
                                   x_buf.at[pl.ds(r, 1), :],
                                   sems.at[r])
        cp.start()
        copies.append(cp)
    for cp in copies:
        cp.wait()

    # ALBERT pooled output: tanh(dense(cls)).  bf16 MXU inputs with f32
    # accumulation; bias add + tanh in f32 (v5e VPU/EUP have no bf16).
    pooled = jnp.tanh(
        jnp.dot(x_buf[...].astype(jnp.bfloat16), wp_ref[...],
                preferred_element_type=jnp.float32)
        + bp_ref[...]
    )

    # dropout(p=0.4) -> identity (inference); fc1 and fc2 folded host-side.
    out_ref[...] = jnp.dot(pooled.astype(jnp.bfloat16), w12_ref[...],
                           preferred_element_type=jnp.float32) + b12_ref[...]


def prepare_albert_head_params(wp, bp, w1, b1, w2, b2):
    """One-time weight preparation (call once, cache the result).

    Folds fc1 into fc2 (exact: no nonlinearity between them in the module,
    dropout is identity at inference), lane-pads the class dim to a multiple
    of 128 and casts the matmul weights to bf16 for the MXU.
    """
    C = w2.shape[1]
    Cp = _round_up(C, LANE)
    w12 = jnp.pad(w1 @ w2, ((0, 0), (0, Cp - C)))         # [H, Cp]  f32 fold
    b12 = jnp.pad(b1 @ w2 + b2, ((0, 0), (0, Cp - C)))    # [1, Cp]
    return {
        "wp": wp.astype(jnp.bfloat16),
        "bp": bp.astype(jnp.float32),
        "w12": w12.astype(jnp.bfloat16),
        "b12": b12.astype(jnp.float32),
        "num_class": C,
    }


def _pick_batch_tile(B, batch_tile):
    """Multiple-of-8 batch tile; >= 2 grid steps when the batch allows (v7x)."""
    tm = min(batch_tile, _round_up(B, SUBLANE))
    if _cdiv(B, tm) < 2 and B >= 2 * SUBLANE:
        tm = _round_up(_cdiv(B, 2), SUBLANE)
    return tm


def albert_classifier_forward(token_ids, hidden_table, prepared, *, batch_tile=128):
    """Full forward (synthetic ALBERT tail + classifier head) in one pallas_call.

    token_ids    : [B, S] int32  (only the CLS column is consumed by the stand-in)
    hidden_table : [V, H] f32    per-token hidden states (stand-in for bert_model)
    prepared     : dict from prepare_albert_head_params()
    Returns [B, num_class] f32 logits.
    """
    wp, bp = prepared["wp"], prepared["bp"]
    w12, b12 = prepared["w12"], prepared["b12"]
    C = prepared["num_class"]
    H = wp.shape[0]
    Cp = w12.shape[1]

    B = token_ids.shape[0]
    tm = _pick_batch_tile(B, batch_tile)
    Bp = _round_up(B, tm)
    grid = (Bp // tm,)

    cls_ids = token_ids[:, 0].astype(jnp.int32)
    if Bp != B:
        # Padded rows gather row 0 and compute throwaway logits, sliced off below.
        cls_ids = jnp.pad(cls_ids, (0, Bp - B))

    cost = pl.CostEstimate(
        flops=2 * Bp * H * (H + Cp),
        transcendentals=Bp * H,                      # tanh
        bytes_accessed=(2 * (H * H + H * Cp)         # bf16 weights
                        + 4 * (H + Cp)               # f32 biases
                        + 4 * Bp * H                 # gathered CLS rows
                        + 4 * Bp * Cp                # logits slab
                        + 4 * Bp),                   # cls ids
    )

    out_padded = pl.pallas_call(
        albert_classifier_kernel,
        out_shape=jax.ShapeDtypeStruct((Bp, Cp), jnp.float32),
        grid_spec=pltpu.PrefetchScalarGridSpec(
            num_scalar_prefetch=1,                   # cls_ids -> SMEM
            grid=grid,
            in_specs=[
                pl.BlockSpec(memory_space=pl.ANY),              # hidden_table in HBM
                pl.BlockSpec((H, H), lambda i, ids: (0, 0)),    # wp   resident
                pl.BlockSpec((1, H), lambda i, ids: (0, 0)),    # bp   resident
                pl.BlockSpec((H, Cp), lambda i, ids: (0, 0)),   # w12  resident
                pl.BlockSpec((1, Cp), lambda i, ids: (0, 0)),   # b12  resident
            ],
            out_specs=pl.BlockSpec((tm, Cp), lambda i, ids: (i, 0)),
            scratch_shapes=[
                pltpu.VMEM((tm, H), jnp.float32),    # gathered CLS rows
                pltpu.SemaphoreType.DMA((tm,)),      # one sem per in-flight row copy
            ],
        ),
        compiler_params=pltpu.CompilerParams(
            # batch axis is embarrassingly parallel -> shards across v7x's 2 TCs
            dimension_semantics=("parallel",),
            vmem_limit_bytes=32 * 1024 * 1024,
        ),
        cost_estimate=cost,
    )(cls_ids, hidden_table, wp, bp, w12, b12)

    # Drop batch padding + lane padding outside the kernel.
    return out_padded[:B, :C]


def reference_forward(token_ids, hidden_table, wp, bp, w1, b1, w2, b2):
    """Pure-JAX f32 reference matching the PyTorch forward (inference mode)."""
    cls_hidden = hidden_table[token_ids[:, 0]]
    pooled = jnp.tanh(cls_hidden @ wp + bp)
    h = pooled @ w1 + b1
    return h @ w2 + b2


if __name__ == "__main__":
    # small, hardware-friendly shapes
    B = 16           # batch (gives a 2-step grid -> exercises multi-tile gather)
    S = 8            # sequence length (token_ids)
    H = 128          # bert_config.hidden_size
    C = 8            # num_class
    VOCAB = 64

    key = jax.random.PRNGKey(0)
    k_tok, k_emb, k_wp, k_bp, k_w1, k_b1, k_w2, k_b2 = jax.random.split(key, 8)

    # synthetic inputs / parameters (deterministic)
    token_ids = jax.random.randint(k_tok, (B, S), 0, VOCAB, dtype=jnp.int32)
    hidden_table = jax.random.normal(k_emb, (VOCAB, H), dtype=jnp.float32) * 0.05

    wp = jax.random.normal(k_wp, (H, H), dtype=jnp.float32) * 0.05
    bp = jax.random.normal(k_bp, (1, H), dtype=jnp.float32) * 0.05
    w1 = jax.random.normal(k_w1, (H, H), dtype=jnp.float32) * 0.05
    b1 = jax.random.normal(k_b1, (1, H), dtype=jnp.float32) * 0.05
    w2 = jax.random.normal(k_w2, (H, C), dtype=jnp.float32) * 0.05
    b2 = jax.random.normal(k_b2, (1, C), dtype=jnp.float32) * 0.05

    # one-time weight prep (fold + pad + bf16 casts), hoisted out of the call path
    prepared = prepare_albert_head_params(wp, bp, w1, b1, w2, b2)

    logits = albert_classifier_forward(token_ids, hidden_table, prepared)
    logits = jax.block_until_ready(logits)

    ref = reference_forward(token_ids, hidden_table, wp, bp, w1, b1, w2, b2)
    assert logits.shape == (B, C), logits.shape
    # bf16 weight storage + fc1*fc2 folding perturb f32 rounding slightly.
    assert jnp.allclose(logits, ref, atol=2e-3, rtol=2e-2), "mismatch vs reference"

    print("KERNEL_OK")
</pallas_src>

<mosaic_0001>
module attributes {stable_mosaic.version = 11 : i64} {
  func.func @albert_classifier_kernel(%arg0: i32, %arg1: memref<16xi32, #tpu.memory_space<smem>>, %arg2: memref<64x128xf32, #tpu.memory_space<any>>, %arg3: memref<128x128xbf16, #tpu.memory_space<vmem>>, %arg4: memref<1x128xf32, #tpu.memory_space<vmem>>, %arg5: memref<128x128xbf16, #tpu.memory_space<vmem>>, %arg6: memref<1x128xf32, #tpu.memory_space<vmem>>, %arg7: memref<8x128xf32, #tpu.memory_space<vmem>>, %arg8: memref<8x128xf32, #tpu.memory_space<vmem>>, %arg9: memref<8x!tpu.dma_semaphore, #tpu.memory_space<semaphore_mem>>) attributes {dimension_semantics = [#tpu.dimension_semantics<parallel>], iteration_bounds = array<i64: 2>, scalar_prefetch = 1 : i64, scratch_operands = 2 : i64, tpu.core_type = #tpu.core_type<tc>, window_params = [{}, {pipeline_mode = #tpu.pipeline_mode<synchronous>, transform_indices = @transform_1, window_bounds = array<i64: 128, 128>}, {pipeline_mode = #tpu.pipeline_mode<synchronous>, transform_indices = @transform_2, window_bounds = array<i64: 1, 128>}, {pipeline_mode = #tpu.pipeline_mode<synchronous>, transform_indices = @transform_3, window_bounds = array<i64: 128, 128>}, {pipeline_mode = #tpu.pipeline_mode<synchronous>, transform_indices = @transform_4, window_bounds = array<i64: 1, 128>}, {transform_indices = @transform_5, window_bounds = array<i64: 8, 128>}]} {
    %c8_i32 = arith.constant 8 : i32
    %0 = arith.muli %arg0, %c8_i32 : i32
    %c0_i32 = arith.constant 0 : i32
    %1 = arith.addi %0, %c0_i32 : i32
    %2 = arith.index_cast %1 : i32 to index
    %3 = memref.load %arg1[%2] : memref<16xi32, #tpu.memory_space<smem>>
    %c0_i32_0 = arith.constant 0 : i32
    %c0_i32_1 = arith.constant 0 : i32
    %4 = tpu.memref_slice %arg2[%3, %c0_i32_1] : memref<64x128xf32, #tpu.memory_space<any>> -> memref<1x128xf32, #tpu.memory_space<any>>
    %c0_i32_2 = arith.constant 0 : i32
    %c0_i32_3 = arith.constant 0 : i32
    %5 = tpu.memref_slice %arg8[%c0_i32_2, %c0_i32_3] : memref<8x128xf32, #tpu.memory_space<vmem>> -> memref<1x128xf32, #tpu.memory_space<vmem>>
    %6 = tpu.memref_slice %arg9[%c0_i32_0] : memref<8x!tpu.dma_semaphore, #tpu.memory_space<semaphore_mem>> -> memref<1x!tpu.dma_semaphore, #tpu.memory_space<semaphore_mem>>
    %7 = tpu.memref_squeeze %6 : memref<1x!tpu.dma_semaphore, #tpu.memory_space<semaphore_mem>> -> memref<!tpu.dma_semaphore, #tpu.memory_space<semaphore_mem>>
    tpu.enqueue_dma source(%4 : memref<1x128xf32, #tpu.memory_space<any>>) target(%5 : memref<1x128xf32, #tpu.memory_space<vmem>>) target_semaphore(%7 : memref<!tpu.dma_semaphore, #tpu.memory_space<semaphore_mem>>)
    %c1_i32 = arith.constant 1 : i32
    %8 = arith.addi %0, %c1_i32 : i32
    %9 = arith.index_cast %8 : i32 to index
    %10 = memref.load %arg1[%9] : memref<16xi32, #tpu.memory_space<smem>>
    %c1_i32_4 = arith.constant 1 : i32
    %c0_i32_5 = arith.constant 0 : i32
    %11 = tpu.memref_slice %arg2[%10, %c0_i32_5] : memref<64x128xf32, #tpu.memory_space<any>> -> memref<1x128xf32, #tpu.memory_space<any>>
    %c1_i32_6 = arith.constant 1 : i32
    %c0_i32_7 = arith.constant 0 : i32
    %12 = tpu.memref_slice %arg8[%c1_i32_6, %c0_i32_7] : memref<8x128xf32, #tpu.memory_space<vmem>> -> memref<1x128xf32, #tpu.memory_space<vmem>>
    %13 = tpu.memref_slice %arg9[%c1_i32_4] : memref<8x!tpu.dma_semaphore, #tpu.memory_space<semaphore_mem>> -> memref<1x!tpu.dma_semaphore, #tpu.memory_space<semaphore_mem>>
    %14 = tpu.memref_squeeze %13 : memref<1x!tpu.dma_semaphore, #tpu.memory_space<semaphore_mem>> -> memref<!tpu.dma_semaphore, #tpu.memory_space<semaphore_mem>>
    tpu.enqueue_dma source(%11 : memref<1x128xf32, #tpu.memory_space<any>>) target(%12 : memref<1x128xf32, #tpu.memory_space<vmem>>) target_semaphore(%14 : memref<!tpu.dma_semaphore, #tpu.memory_space<semaphore_mem>>)
    %c2_i32 = arith.constant 2 : i32
    %15 = arith.addi %0, %c2_i32 : i32
    %16 = arith.index_cast %15 : i32 to index
    %17 = memref.load %arg1[%16] : memref<16xi32, #tpu.memory_space<smem>>
    %c2_i32_8 = arith.constant 2 : i32
    %c0_i32_9 = arith.constant 0 : i32
    %18 = tpu.memref_slice %arg2[%17, %c0_i32_9] : memref<64x128xf32, #tpu.memory_space<any>> -> memref<1x128xf32, #tpu.memory_space<any>>
    %c2_i32_10 = arith.constant 2 : i32
    %c0_i32_11 = arith.constant 0 : i32
    %19 = tpu.memref_slice %arg8[%c2_i32_10, %c0_i32_11] : memref<8x128xf32, #tpu.memory_space<vmem>> -> memref<1x128xf32, #tpu.memory_space<vmem>>
    %20 = tpu.memref_slice %arg9[%c2_i32_8] : memref<8x!tpu.dma_semaphore, #tpu.memory_space<semaphore_mem>> -> memref<1x!tpu.dma_semaphore, #tpu.memory_space<semaphore_mem>>
    %21 = tpu.memref_squeeze %20 : memref<1x!tpu.dma_semaphore, #tpu.memory_space<semaphore_mem>> -> memref<!tpu.dma_semaphore, #tpu.memory_space<semaphore_mem>>
    tpu.enqueue_dma source(%18 : memref<1x128xf32, #tpu.memory_space<any>>) target(%19 : memref<1x128xf32, #tpu.memory_space<vmem>>) target_semaphore(%21 : memref<!tpu.dma_semaphore, #tpu.memory_space<semaphore_mem>>)
    %c3_i32 = arith.constant 3 : i32
    %22 = arith.addi %0, %c3_i32 : i32
    %23 = arith.index_cast %22 : i32 to index
    %24 = memref.load %arg1[%23] : memref<16xi32, #tpu.memory_space<smem>>
    %c3_i32_12 = arith.constant 3 : i32
    %c0_i32_13 = arith.constant 0 : i32
    %25 = tpu.memref_slice %arg2[%24, %c0_i32_13] : memref<64x128xf32, #tpu.memory_space<any>> -> memref<1x128xf32, #tpu.memory_space<any>>
    %c3_i32_14 = arith.constant 3 : i32
    %c0_i32_15 = arith.constant 0 : i32
    %26 = tpu.memref_slice %arg8[%c3_i32_14, %c0_i32_15] : memref<8x128xf32, #tpu.memory_space<vmem>> -> memref<1x128xf32, #tpu.memory_space<vmem>>
    %27 = tpu.memref_slice %arg9[%c3_i32_12] : memref<8x!tpu.dma_semaphore, #tpu.memory_space<semaphore_mem>> -> memref<1x!tpu.dma_semaphore, #tpu.memory_space<semaphore_mem>>
    %28 = tpu.memref_squeeze %27 : memref<1x!tpu.dma_semaphore, #tpu.memory_space<semaphore_mem>> -> memref<!tpu.dma_semaphore, #tpu.memory_space<semaphore_mem>>
    tpu.enqueue_dma source(%25 : memref<1x128xf32, #tpu.memory_space<any>>) target(%26 : memref<1x128xf32, #tpu.memory_space<vmem>>) target_semaphore(%28 : memref<!tpu.dma_semaphore, #tpu.memory_space<semaphore_mem>>)
    %c4_i32 = arith.constant 4 : i32
    %29 = arith.addi %0, %c4_i32 : i32
    %30 = arith.index_cast %29 : i32 to index
    %31 = memref.load %arg1[%30] : memref<16xi32, #tpu.memory_space<smem>>
    %c4_i32_16 = arith.constant 4 : i32
    %c0_i32_17 = arith.constant 0 : i32
    %32 = tpu.memref_slice %arg2[%31, %c0_i32_17] : memref<64x128xf32, #tpu.memory_space<any>> -> memref<1x128xf32, #tpu.memory_space<any>>
    %c4_i32_18 = arith.constant 4 : i32
    %c0_i32_19 = arith.constant 0 : i32
    %33 = tpu.memref_slice %arg8[%c4_i32_18, %c0_i32_19] : memref<8x128xf32, #tpu.memory_space<vmem>> -> memref<1x128xf32, #tpu.memory_space<vmem>>
    %34 = tpu.memref_slice %arg9[%c4_i32_16] : memref<8x!tpu.dma_semaphore, #tpu.memory_space<semaphore_mem>> -> memref<1x!tpu.dma_semaphore, #tpu.memory_space<semaphore_mem>>
    %35 = tpu.memref_squeeze %34 : memref<1x!tpu.dma_semaphore, #tpu.memory_space<semaphore_mem>> -> memref<!tpu.dma_semaphore, #tpu.memory_space<semaphore_mem>>
    tpu.enqueue_dma source(%32 : memref<1x128xf32, #tpu.memory_space<any>>) target(%33 : memref<1x128xf32, #tpu.memory_space<vmem>>) target_semaphore(%35 : memref<!tpu.dma_semaphore, #tpu.memory_space<semaphore_mem>>)
    %c5_i32 = arith.constant 5 : i32
    %36 = arith.addi %0, %c5_i32 : i32
    %37 = arith.index_cast %36 : i32 to index
    %38 = memref.load %arg1[%37] : memref<16xi32, #tpu.memory_space<smem>>
    %c5_i32_20 = arith.constant 5 : i32
    %c0_i32_21 = arith.constant 0 : i32
    %39 = tpu.memref_slice %arg2[%38, %c0_i32_21] : memref<64x128xf32, #tpu.memory_space<any>> -> memref<1x128xf32, #tpu.memory_space<any>>
    %c5_i32_22 = arith.constant 5 : i32
    %c0_i32_23 = arith.constant 0 : i32
    %40 = tpu.memref_slice %arg8[%c5_i32_22, %c0_i32_23] : memref<8x128xf32, #tpu.memory_space<vmem>> -> memref<1x128xf32, #tpu.memory_space<vmem>>
    %41 = tpu.memref_slice %arg9[%c5_i32_20] : memref<8x!tpu.dma_semaphore, #tpu.memory_space<semaphore_mem>> -> memref<1x!tpu.dma_semaphore, #tpu.memory_space<semaphore_mem>>
    %42 = tpu.memref_squeeze %41 : memref<1x!tpu.dma_semaphore, #tpu.memory_space<semaphore_mem>> -> memref<!tpu.dma_semaphore, #tpu.memory_space<semaphore_mem>>
    tpu.enqueue_dma source(%39 : memref<1x128xf32, #tpu.memory_space<any>>) target(%40 : memref<1x128xf32, #tpu.memory_space<vmem>>) target_semaphore(%42 : memref<!tpu.dma_semaphore, #tpu.memory_space<semaphore_mem>>)
    %c6_i32 = arith.constant 6 : i32
    %43 = arith.addi %0, %c6_i32 : i32
    %44 = arith.index_cast %43 : i32 to index
    %45 = memref.load %arg1[%44] : memref<16xi32, #tpu.memory_space<smem>>
    %c6_i32_24 = arith.constant 6 : i32
    %c0_i32_25 = arith.constant 0 : i32
    %46 = tpu.memref_slice %arg2[%45, %c0_i32_25] : memref<64x128xf32, #tpu.memory_space<any>> -> memref<1x128xf32, #tpu.memory_space<any>>
    %c6_i32_26 = arith.constant 6 : i32
    %c0_i32_27 = arith.constant 0 : i32
    %47 = tpu.memref_slice %arg8[%c6_i32_26, %c0_i32_27] : memref<8x128xf32, #tpu.memory_space<vmem>> -> memref<1x128xf32, #tpu.memory_space<vmem>>
    %48 = tpu.memref_slice %arg9[%c6_i32_24] : memref<8x!tpu.dma_semaphore, #tpu.memory_space<semaphore_mem>> -> memref<1x!tpu.dma_semaphore, #tpu.memory_space<semaphore_mem>>
    %49 = tpu.memref_squeeze %48 : memref<1x!tpu.dma_semaphore, #tpu.memory_space<semaphore_mem>> -> memref<!tpu.dma_semaphore, #tpu.memory_space<semaphore_mem>>
    tpu.enqueue_dma source(%46 : memref<1x128xf32, #tpu.memory_space<any>>) target(%47 : memref<1x128xf32, #tpu.memory_space<vmem>>) target_semaphore(%49 : memref<!tpu.dma_semaphore, #tpu.memory_space<semaphore_mem>>)
    %c7_i32 = arith.constant 7 : i32
    %50 = arith.addi %0, %c7_i32 : i32
    %51 = arith.index_cast %50 : i32 to index
    %52 = memref.load %arg1[%51] : memref<16xi32, #tpu.memory_space<smem>>
    %c7_i32_28 = arith.constant 7 : i32
    %c0_i32_29 = arith.constant 0 : i32
    %53 = tpu.memref_slice %arg2[%52, %c0_i32_29] : memref<64x128xf32, #tpu.memory_space<any>> -> memref<1x128xf32, #tpu.memory_space<any>>
    %c7_i32_30 = arith.constant 7 : i32
    %c0_i32_31 = arith.constant 0 : i32
    %54 = tpu.memref_slice %arg8[%c7_i32_30, %c0_i32_31] : memref<8x128xf32, #tpu.memory_space<vmem>> -> memref<1x128xf32, #tpu.memory_space<vmem>>
    %55 = tpu.memref_slice %arg9[%c7_i32_28] : memref<8x!tpu.dma_semaphore, #tpu.memory_space<semaphore_mem>> -> memref<1x!tpu.dma_semaphore, #tpu.memory_space<semaphore_mem>>
    %56 = tpu.memref_squeeze %55 : memref<1x!tpu.dma_semaphore, #tpu.memory_space<semaphore_mem>> -> memref<!tpu.dma_semaphore, #tpu.memory_space<semaphore_mem>>
    tpu.enqueue_dma source(%53 : memref<1x128xf32, #tpu.memory_space<any>>) target(%54 : memref<1x128xf32, #tpu.memory_space<vmem>>) target_semaphore(%56 : memref<!tpu.dma_semaphore, #tpu.memory_space<semaphore_mem>>)
    %c0_i32_32 = arith.constant 0 : i32
    %c0_i32_33 = arith.constant 0 : i32
    %57 = tpu.memref_slice %arg2[%3, %c0_i32_33] : memref<64x128xf32, #tpu.memory_space<any>> -> memref<1x128xf32, #tpu.memory_space<any>>
    %c0_i32_34 = arith.constant 0 : i32
    %c0_i32_35 = arith.constant 0 : i32
    %58 = tpu.memref_slice %arg8[%c0_i32_34, %c0_i32_35] : memref<8x128xf32, #tpu.memory_space<vmem>> -> memref<1x128xf32, #tpu.memory_space<vmem>>
    %59 = tpu.memref_slice %arg9[%c0_i32_32] : memref<8x!tpu.dma_semaphore, #tpu.memory_space<semaphore_mem>> -> memref<1x!tpu.dma_semaphore, #tpu.memory_space<semaphore_mem>>
    %60 = tpu.memref_squeeze %59 : memref<1x!tpu.dma_semaphore, #tpu.memory_space<semaphore_mem>> -> memref<!tpu.dma_semaphore, #tpu.memory_space<semaphore_mem>>
    tpu.wait_dma2 semaphore(%60 : memref<!tpu.dma_semaphore, #tpu.memory_space<semaphore_mem>>) src(%57 : memref<1x128xf32, #tpu.memory_space<any>>) dst(%58 : memref<1x128xf32, #tpu.memory_space<vmem>>)
    %c1_i32_36 = arith.constant 1 : i32
    %c0_i32_37 = arith.constant 0 : i32
    %61 = tpu.memref_slice %arg2[%10, %c0_i32_37] : memref<64x128xf32, #tpu.memory_space<any>> -> memref<1x128xf32, #tpu.memory_space<any>>
    %c1_i32_38 = arith.constant 1 : i32
    %c0_i32_39 = arith.constant 0 : i32
    %62 = tpu.memref_slice %arg8[%c1_i32_38, %c0_i32_39] : memref<8x128xf32, #tpu.memory_space<vmem>> -> memref<1x128xf32, #tpu.memory_space<vmem>>
    %63 = tpu.memref_slice %arg9[%c1_i32_36] : memref<8x!tpu.dma_semaphore, #tpu.memory_space<semaphore_mem>> -> memref<1x!tpu.dma_semaphore, #tpu.memory_space<semaphore_mem>>
    %64 = tpu.memref_squeeze %63 : memref<1x!tpu.dma_semaphore, #tpu.memory_space<semaphore_mem>> -> memref<!tpu.dma_semaphore, #tpu.memory_space<semaphore_mem>>
    tpu.wait_dma2 semaphore(%64 : memref<!tpu.dma_semaphore, #tpu.memory_space<semaphore_mem>>) src(%61 : memref<1x128xf32, #tpu.memory_space<any>>) dst(%62 : memref<1x128xf32, #tpu.memory_space<vmem>>)
    %c2_i32_40 = arith.constant 2 : i32
    %c0_i32_41 = arith.constant 0 : i32
    %65 = tpu.memref_slice %arg2[%17, %c0_i32_41] : memref<64x128xf32, #tpu.memory_space<any>> -> memref<1x128xf32, #tpu.memory_space<any>>
    %c2_i32_42 = arith.constant 2 : i32
    %c0_i32_43 = arith.constant 0 : i32
    %66 = tpu.memref_slice %arg8[%c2_i32_42, %c0_i32_43] : memref<8x128xf32, #tpu.memory_space<vmem>> -> memref<1x128xf32, #tpu.memory_space<vmem>>
    %67 = tpu.memref_slice %arg9[%c2_i32_40] : memref<8x!tpu.dma_semaphore, #tpu.memory_space<semaphore_mem>> -> memref<1x!tpu.dma_semaphore, #tpu.memory_space<semaphore_mem>>
    %68 = tpu.memref_squeeze %67 : memref<1x!tpu.dma_semaphore, #tpu.memory_space<semaphore_mem>> -> memref<!tpu.dma_semaphore, #tpu.memory_space<semaphore_mem>>
    tpu.wait_dma2 semaphore(%68 : memref<!tpu.dma_semaphore, #tpu.memory_space<semaphore_mem>>) src(%65 : memref<1x128xf32, #tpu.memory_space<any>>) dst(%66 : memref<1x128xf32, #tpu.memory_space<vmem>>)
    %c3_i32_44 = arith.constant 3 : i32
    %c0_i32_45 = arith.constant 0 : i32
    %69 = tpu.memref_slice %arg2[%24, %c0_i32_45] : memref<64x128xf32, #tpu.memory_space<any>> -> memref<1x128xf32, #tpu.memory_space<any>>
    %c3_i32_46 = arith.constant 3 : i32
    %c0_i32_47 = arith.constant 0 : i32
    %70 = tpu.memref_slice %arg8[%c3_i32_46, %c0_i32_47] : memref<8x128xf32, #tpu.memory_space<vmem>> -> memref<1x128xf32, #tpu.memory_space<vmem>>
    %71 = tpu.memref_slice %arg9[%c3_i32_44] : memref<8x!tpu.dma_semaphore, #tpu.memory_space<semaphore_mem>> -> memref<1x!tpu.dma_semaphore, #tpu.memory_space<semaphore_mem>>
    %72 = tpu.memref_squeeze %71 : memref<1x!tpu.dma_semaphore, #tpu.memory_space<semaphore_mem>> -> memref<!tpu.dma_semaphore, #tpu.memory_space<semaphore_mem>>
    tpu.wait_dma2 semaphore(%72 : memref<!tpu.dma_semaphore, #tpu.memory_space<semaphore_mem>>) src(%69 : memref<1x128xf32, #tpu.memory_space<any>>) dst(%70 : memref<1x128xf32, #tpu.memory_space<vmem>>)
    %c4_i32_48 = arith.constant 4 : i32
    %c0_i32_49 = arith.constant 0 : i32
    %73 = tpu.memref_slice %arg2[%31, %c0_i32_49] : memref<64x128xf32, #tpu.memory_space<any>> -> memref<1x128xf32, #tpu.memory_space<any>>
    %c4_i32_50 = arith.constant 4 : i32
    %c0_i32_51 = arith.constant 0 : i32
    %74 = tpu.memref_slice %arg8[%c4_i32_50, %c0_i32_51] : memref<8x128xf32, #tpu.memory_space<vmem>> -> memref<1x128xf32, #tpu.memory_space<vmem>>
    %75 = tpu.memref_slice %arg9[%c4_i32_48] : memref<8x!tpu.dma_semaphore, #tpu.memory_space<semaphore_mem>> -> memref<1x!tpu.dma_semaphore, #tpu.memory_space<semaphore_mem>>
    %76 = tpu.memref_squeeze %75 : memref<1x!tpu.dma_semaphore, #tpu.memory_space<semaphore_mem>> -> memref<!tpu.dma_semaphore, #tpu.memory_space<semaphore_mem>>
    tpu.wait_dma2 semaphore(%76 : memref<!tpu.dma_semaphore, #tpu.memory_space<semaphore_mem>>) src(%73 : memref<1x128xf32, #tpu.memory_space<any>>) dst(%74 : memref<1x128xf32, #tpu.memory_space<vmem>>)
    %c5_i32_52 = arith.constant 5 : i32
    %c0_i32_53 = arith.constant 0 : i32
    %77 = tpu.memref_slice %arg2[%38, %c0_i32_53] : memref<64x128xf32, #tpu.memory_space<any>> -> memref<1x128xf32, #tpu.memory_space<any>>
    %c5_i32_54 = arith.constant 5 : i32
    %c0_i32_55 = arith.constant 0 : i32
    %78 = tpu.memref_slice %arg8[%c5_i32_54, %c0_i32_55] : memref<8x128xf32, #tpu.memory_space<vmem>> -> memref<1x128xf32, #tpu.memory_space<vmem>>
    %79 = tpu.memref_slice %arg9[%c5_i32_52] : memref<8x!tpu.dma_semaphore, #tpu.memory_space<semaphore_mem>> -> memref<1x!tpu.dma_semaphore, #tpu.memory_space<semaphore_mem>>
    %80 = tpu.memref_squeeze %79 : memref<1x!tpu.dma_semaphore, #tpu.memory_space<semaphore_mem>> -> memref<!tpu.dma_semaphore, #tpu.memory_space<semaphore_mem>>
    tpu.wait_dma2 semaphore(%80 : memref<!tpu.dma_semaphore, #tpu.memory_space<semaphore_mem>>) src(%77 : memref<1x128xf32, #tpu.memory_space<any>>) dst(%78 : memref<1x128xf32, #tpu.memory_space<vmem>>)
    %c6_i32_56 = arith.constant 6 : i32
    %c0_i32_57 = arith.constant 0 : i32
    %81 = tpu.memref_slice %arg2[%45, %c0_i32_57] : memref<64x128xf32, #tpu.memory_space<any>> -> memref<1x128xf32, #tpu.memory_space<any>>
    %c6_i32_58 = arith.constant 6 : i32
    %c0_i32_59 = arith.constant 0 : i32
    %82 = tpu.memref_slice %arg8[%c6_i32_58, %c0_i32_59] : memref<8x128xf32, #tpu.memory_space<vmem>> -> memref<1x128xf32, #tpu.memory_space<vmem>>
    %83 = tpu.memref_slice %arg9[%c6_i32_56] : memref<8x!tpu.dma_semaphore, #tpu.memory_space<semaphore_mem>> -> memref<1x!tpu.dma_semaphore, #tpu.memory_space<semaphore_mem>>
    %84 = tpu.memref_squeeze %83 : memref<1x!tpu.dma_semaphore, #tpu.memory_space<semaphore_mem>> -> memref<!tpu.dma_semaphore, #tpu.memory_space<semaphore_mem>>
    tpu.wait_dma2 semaphore(%84 : memref<!tpu.dma_semaphore, #tpu.memory_space<semaphore_mem>>) src(%81 : memref<1x128xf32, #tpu.memory_space<any>>) dst(%82 : memref<1x128xf32, #tpu.memory_space<vmem>>)
    %c7_i32_60 = arith.constant 7 : i32
    %c0_i32_61 = arith.constant 0 : i32
    %85 = tpu.memref_slice %arg2[%52, %c0_i32_61] : memref<64x128xf32, #tpu.memory_space<any>> -> memref<1x128xf32, #tpu.memory_space<any>>
    %c7_i32_62 = arith.constant 7 : i32
    %c0_i32_63 = arith.constant 0 : i32
    %86 = tpu.memref_slice %arg8[%c7_i32_62, %c0_i32_63] : memref<8x128xf32, #tpu.memory_space<vmem>> -> memref<1x128xf32, #tpu.memory_space<vmem>>
    %87 = tpu.memref_slice %arg9[%c7_i32_60] : memref<8x!tpu.dma_semaphore, #tpu.memory_space<semaphore_mem>> -> memref<1x!tpu.dma_semaphore, #tpu.memory_space<semaphore_mem>>
    %88 = tpu.memref_squeeze %87 : memref<1x!tpu.dma_semaphore, #tpu.memory_space<semaphore_mem>> -> memref<!tpu.dma_semaphore, #tpu.memory_space<semaphore_mem>>
    tpu.wait_dma2 semaphore(%88 : memref<!tpu.dma_semaphore, #tpu.memory_space<semaphore_mem>>) src(%85 : memref<1x128xf32, #tpu.memory_space<any>>) dst(%86 : memref<1x128xf32, #tpu.memory_space<vmem>>)
    %c0 = arith.constant 0 : index
    %c0_64 = arith.constant 0 : index
    %89 = vector.load %arg8[%c0, %c0_64] : memref<8x128xf32, #tpu.memory_space<vmem>>, vector<8x128xf32>
    %90 = arith.truncf %89 : vector<8x128xf32> to vector<8x128xbf16>
    %c0_65 = arith.constant 0 : index
    %c0_66 = arith.constant 0 : index
    %91 = vector.load %arg3[%c0_65, %c0_66] : memref<128x128xbf16, #tpu.memory_space<vmem>>, vector<128x128xbf16>
    %cst = arith.constant dense<0.000000e+00> : vector<8x128xf32>
    %92 = tpu.matmul %90, %91, %cst {dimension_numbers = #tpu.dot_dimension_numbers<[1], [0], [0], [1], [0, 0, 1, 1], [], []>} : vector<8x128xbf16>, vector<128x128xbf16>, vector<8x128xf32> -> vector<8x128xf32>
    %c0_67 = arith.constant 0 : index
    %c0_68 = arith.constant 0 : index
    %93 = vector.load %arg4[%c0_67, %c0_68] : memref<1x128xf32, #tpu.memory_space<vmem>>, vector<1x128xf32>
    %94 = vector.broadcast %93 : vector<1x128xf32> to vector<8x128xf32>
    %95 = arith.addf %92, %94 : vector<8x128xf32>
    %96 = math.tanh %95 : vector<8x128xf32>
    %97 = arith.truncf %96 : vector<8x128xf32> to vector<8x128xbf16>
    %c0_69 = arith.constant 0 : index
    %c0_70 = arith.constant 0 : index
    %98 = vector.load %arg5[%c0_69, %c0_70] : memref<128x128xbf16, #tpu.memory_space<vmem>>, vector<128x128xbf16>
    %cst_71 = arith.constant dense<0.000000e+00> : vector<8x128xf32>
    %99 = tpu.matmul %97, %98, %cst_71 {dimension_numbers = #tpu.dot_dimension_numbers<[1], [0], [0], [1], [0, 0, 1, 1], [], []>} : vector<8x128xbf16>, vector<128x128xbf16>, vector<8x128xf32> -> vector<8x128xf32>
    %c0_72 = arith.constant 0 : index
    %c0_73 = arith.constant 0 : index
    %100 = vector.load %arg6[%c0_72, %c0_73] : memref<1x128xf32, #tpu.memory_space<vmem>>, vector<1x128xf32>
    %101 = vector.broadcast %100 : vector<1x128xf32> to vector<8x128xf32>
    %102 = arith.addf %99, %101 : vector<8x128xf32>
    %c0_74 = arith.constant 0 : index
    %c0_75 = arith.constant 0 : index
    %103 = vector.load %arg7[%c0_74, %c0_75] : memref<8x128xf32, #tpu.memory_space<vmem>>, vector<8x128xf32>
    tpu.vector_store %arg7[%c0_74, %c0_75], %102 {strides = array<i32>} : memref<8x128xf32, #tpu.memory_space<vmem>>, vector<8x128xf32>,
    return
  }
  func.func @transform_1(%arg0: i32, %arg1: memref<16xi32, #tpu.memory_space<smem>>) -> (i32, i32) {
    %c0_i32 = arith.constant 0 : i32
    %c0_i32_0 = arith.constant 0 : i32
    %c0_i32_1 = arith.constant 0 : i32
    return %c0_i32, %c0_i32_0 : i32, i32
  }
  func.func @transform_2(%arg0: i32, %arg1: memref<16xi32, #tpu.memory_space<smem>>) -> (i32, i32) {
    %c0_i32 = arith.constant 0 : i32
    %c0_i32_0 = arith.constant 0 : i32
    %c0_i32_1 = arith.constant 0 : i32
    return %c0_i32, %c0_i32_0 : i32, i32
  }
  func.func @transform_3(%arg0: i32, %arg1: memref<16xi32, #tpu.memory_space<smem>>) -> (i32, i32) {
    %c0_i32 = arith.constant 0 : i32
    %c0_i32_0 = arith.constant 0 : i32
    %c0_i32_1 = arith.constant 0 : i32
    return %c0_i32, %c0_i32_0 : i32, i32
  }
  func.func @transform_4(%arg0: i32, %arg1: memref<16xi32, #tpu.memory_space<smem>>) -> (i32, i32) {
    %c0_i32 = arith.constant 0 : i32
    %c0_i32_0 = arith.constant 0 : i32
    %c0_i32_1 = arith.constant 0 : i32
    return %c0_i32, %c0_i32_0 : i32, i32
  }
  func.func @transform_5(%arg0: i32, %arg1: memref<16xi32, #tpu.memory_space<smem>>) -> (i32, i32) {
    %c0_i32 = arith.constant 0 : i32
    %c0_i32_0 = arith.constant 0 : i32
    return %arg0, %c0_i32 : i32, i32
  }
}

</mosaic_0001>

<bundles_post_ra>
// kernel: tpu_custom_call.1
= control target key start
LH: loop header
LB: loop body
LE: loop exit
PB: predicated region body
PF: predicated region fallthrough
CT: control target
= control target key end

     0   :  { %s1663_s0 = inlined_call_operand.hbm [shape: s32[16], index: 0, kind: input, shape index: {}]   ;;  %s1664_s1 = inlined_call_operand.hbm [shape: f32[64,128], index: 1, kind: input, shape index: {}]   ;;  %s1665_s2 = inlined_call_operand.hbm [shape: bf16[128,128], index: 2, kind: input, shape index: {}]   ;;  %s1666_s3 = inlined_call_operand.vmem [shape: f32[1,128], index: 3, kind: input, shape index: {}]   ;;  %s1667_s4 = inlined_call_operand.hbm [shape: bf16[128,128], index: 4, kind: input, shape index: {}]   ;;  %s1668_s5 = inlined_call_operand.vmem [shape: f32[1,128], index: 5, kind: input, shape index: {}]   ;;  %s1669_s6 = inlined_call_operand.hbm [shape: f32[16,128], index: 6, kind: output, shape index: {}]  }
   0x1   :  { %1677 = sst [smem:[#allocation45_spill]] %s1665_s2  ;;  %s941_s23 = scalar_lea.hbm %s1663_s0, 16 }
   0x2   :  { %1678 = sst [smem:[#allocation46_spill]] %s1667_s4  ;;  %p942_p0 = scmp.ne.s32.totalorder %s1663_s0, %s941_s23 }
   0x3   :  { %p945_p1 = scmp.lt.u32.totalorder %s941_s23, %s1663_s0 }
   0x5   :  { %p947_p2 = pnand %p945_p1, %p942_p0 }
   0x7   :  { %950 = shalt.err (!%p947_p2)  }
   0x8   :  { %s1289_s28 = smov [#allocation5]  }
   0x9   :  { %12 = dma.hbm_to_smem %s1663_s0, 16, %s1289_s28, [#allocation4] }
   0xa   :  { %1243 = dma.done.wait [#allocation4], 16 }
   0xb   :  { %1244 = vsyncadd [#allocation4], 4294967280 }
   0xc   :  { %14 = sfence }
   0xd   :  { %15 = vsyncpa [#allocation7], 0 }
   0xe   :  { %16 = vsyncpa [#allocation10], 0 }
   0xf   :  { %17 = vsyncpa [#allocation8], 0 }
  0x10   :  { %19 = vsyncpa [#allocation8 + $0x1], 0  ;;  %s1352_s7 = smov 0   ;;  %s1354_s8 = smov 0  }
  0x11   :  { %s1356_s9 = smov 0   ;;  %s1358_s10 = smov 0  }
  0x12 LB: > { %1679 = sst [smem:[#allocation42_spill]] %s1283_s9  ;;  %s1373_s0 = sadd.s32 4294967295, %s1287_s10   ;;  %s1287_s10 = sphi %s1358_s10, %s1696_s10   ;;  %s1283_s9 = sphi %s1356_s9, %s1698_s9   ;;  %s1279_s8 = sphi %s1354_s8, %s1700_s8   ;;  %s1275_s7 = sphi %s1352_s7, %s1699_s7  }
  0x13   : > { %s745_s11 = sadd.s32 4294967294, %s1287_s10   ;;  %s1377_s12 = sadd.s32 1, %s1287_s10  }
  0x14   : > { %1680 = sst [smem:[#allocation43_spill]] %s1377_s12  ;;  %s116_s13 = sadd.s32 1, %s1283_s9 }
  0x15   : > { %s113_s14 = ssub.s32 %s1287_s10, %s1377_s12  ;;  %p126_p3 = scmp.ne.s32.totalorder %s1283_s9, %s1279_s8 }
  0x16   : > { %p114_p4 = scmp.eq.s32.totalorder %s113_s14, 0  ;;  %p127_p5 = scmp.eq.s32.totalorder %s1373_s0, 1 }
  0x17   : > { %p132_p6 = scmp.ne.s32.totalorder %s1279_s8, %s1275_s7  ;;  %p133_p7 = scmp.eq.s32.totalorder %s745_s11, 1 }
  0x18   : > { %s1388_s15 = scalar_select %p114_p4, %s1283_s9, %s116_s13  }
  0x19   : > { %p1390_p8 = por %p127_p5, %p126_p3  ;;  %p1394_p9 = por %p133_p7, %p132_p6 }
  0x1a   : > { %1681 = sst [smem:[#allocation44_spill]] %s1388_s15  ;;  %p746_p10 = scmp.ge.s32.totalorder %s1287_s10, 1 }
  0x1b   : > { %s1682_s16 = scalar_select %p1390_p8, 1, 0 }
  0x1c   : > { %s1683_s17 = scalar_select %p1394_p9, 1, 0 }
  0x1d   : > { %p140_p11 = scmp.lt.s32.totalorder %s1287_s10, 3  ;;  %p1670_p12 = scmp.eq.s32.totalorder %s1373_s0, 0 }
  0x1e   : > { %s1290_s19 = smov [#allocation6]   ;;  %s1291_s22 = smov [#allocation9]  }
  0x1f   : > { %p1401_p13 = pnand %p746_p10, %p140_p11  ;;  %s152_s20 = sshll.u32 %s1290_s19, 4  ;;  %s153_s20 = int_to_ptr.vmem [resolvable:$true] %s152_s20 }
  0x20   : > { %s168_s23 = sshll.u32 %s1291_s22, 4  ;;  %s1686_s2 = sld [smem:[#allocation45_spill]]  ;;  %s1413_s23 = int_to_ptr.vmem [resolvable:$true] %s168_s23 }
  0x21   : > { %s1684_s18 = scalar_select %p1401_p13, 1, 0 }
  0x22   : > { %p860_p0 = pneg %p1401_p13 }
  0x24   : > { %p1409_p1 = pnand %p1670_p12, %p860_p0 }
  0x26   : > { %s951_s26 = scalar_lea.hbm %s1686_s2, 1024  ;;  %p953_p3 = pneg %p1409_p1 }
  0x27   : > { %p952_p2 = scmp.ne.s32.totalorder %s1686_s2, %s951_s26  ;;  %p958_p6 = scmp.lt.u32.totalorder %s951_s26, %s1686_s2 }
  0x29   : > { %p954_p4 = pnand %p953_p3, %p952_p2 }
  0x2b   : > { %p955_p5 = pneg %p954_p4 }
  0x2d   : > { %p960_p7 = pnand %p958_p6, %p955_p5 }
  0x2f   : > { %963 = shalt.err (!%p960_p7)
}
  0x30   : > { %s964_s11 = scalar_lea.vmem %s153_s20, 1024  ;;  %p972_p12 = scmp.lt.s32.totalorder %s153_s20, %s153_s20 }
  0x31   : > { %p965_p10 = scmp.ne.s32.totalorder %s153_s20, %s964_s11  ;;  %p973_p9 = scmp.lt.s32.totalorder %s964_s11, %s964_s11 }
  0x33   : > { %p967_p11 = pnand %p965_p10, %p953_p3  ;;  %p974_p8 = por %p973_p9, %p972_p12 }
  0x35   : > { %p968_p0 = pneg %p967_p11 }
  0x37   : > { %p975_p13 = pnand %p974_p8, %p968_p0 }
  0x39   : > { %978 = shalt.err (!%p975_p13)
}
  0x3a   : > { %s1292_s13 = smov 64   ;;  %s1293_s14 = smov 4  }
  0x3b   : > { %863 = dma.hbm_to_vmem [thread:$0]  (!%p1409_p1), %s1686_s2, 1024, %s153_s20, [#allocation7], %s1292_s13, %s1292_s13, %s1293_s14  }
  0x3c   : > { %s1687_s4 = sld [smem:[#allocation46_spill]] }
  0x42   : > { %s979_s26 = scalar_lea.hbm %s1687_s4, 1024 }
  0x43   : > { %p980_p2 = scmp.ne.s32.totalorder %s1687_s4, %s979_s26  ;;  %p986_p12 = scmp.lt.u32.totalorder %s979_s26, %s1687_s4 }
  0x45   : > { %p982_p8 = pnand %p980_p2, %p953_p3 }
  0x47   : > { %p983_p9 = pneg %p982_p8 }
  0x49   : > { %p988_p13 = pnand %p986_p12, %p983_p9 }
  0x4b   : > { %991 = shalt.err (!%p988_p13)
}
  0x4c   : > { %s992_s20 = scalar_lea.vmem %s1413_s23, 1024  ;;  %p1000_p7 = scmp.lt.s32.totalorder %s1413_s23, %s1413_s23 }
  0x4d   : > { %p993_p4 = scmp.ne.s32.totalorder %s1413_s23, %s992_s20  ;;  %p1001_p10 = scmp.lt.s32.totalorder %s992_s20, %s992_s20 }
  0x4f   : > { %p995_p5 = pnand %p993_p4, %p953_p3  ;;  %p1002_p11 = por %p1001_p10, %p1000_p7 }
  0x51   : > { %p996_p6 = pneg %p995_p5 }
  0x53   : > { %p1003_p0 = pnand %p1002_p11, %p996_p6 }
  0x55   : > { %1006 = shalt.err (!%p1003_p0)
}
  0x56   : > { %866 = dma.hbm_to_vmem [thread:$0]  (!%p1409_p1), %s1687_s4, 1024, %s1413_s23, [#allocation10], %s1292_s13, %s1292_s13, %s1293_s14  }
  0x57   : > { %p1688_p2 = scmp.ne.s32.totalorder %s1684_s18, 0 }
  0x58   : > { %p1689_p8 = scmp.eq.s32.totalorder (!%p1688_p2), %s1373_s0, 0 }
  0x59   : > { %187 = sbr.rel (%p1688_p2) target bundleno = 787 (0x313), region = 36 }
  0x60   : > { %1246 = dma.done.wait (%p1689_p8), [#allocation7], 1024   ;;  %p1690_p3 = pmov %p1689_p8 }
  0x62   : > { %1248 = vsyncadd (%p1690_p3), [#allocation7], 4294966272  ;;  %p1691_p9 = pmov %p1690_p3 }
  0x63   : > { %p1692_p12 = pmov %p1690_p3 }
  0x64   : > { %1250 = dma.done.wait (%p1691_p9), [#allocation10], 1024  }
  0x65   : > { %1252 = vsyncadd (%p1692_p12), [#allocation10], 4294966272  ;;  %s1673_s21 = sand.u32 1, %s1279_s8   ;;  %s1474_s23 = sshll.u32 %s1373_s0, 3 }
  0x66   : > { %s1478_s18 = sshll.u32 %s1673_s21, 3  ;;  %s214_s13 = sld [smem:[#allocation5 + %s1474_s23]] }
  0x67   : > { %s1294_s14 = smov [#allocation2]   ;;  %s228_s24 = sadd.s32 1, %s1474_s23 }
  0x68   : > { %s224_s22 = sshll.u32 %s1294_s14, 4  ;;  %s1484_s25 = sld [smem:[#allocation5 + %s228_s24]]  ;;  %s1482_s22 = int_to_ptr.vmem [resolvable:$true] %s224_s22 }
  0x69   : > { %s245_s26 = sadd.s32 2, %s1474_s23  ;;  %s1295_s27 = smov [#allocation2 + $0x1]  }
  0x6a   : > { %s241_s28 = sshll.u32 %s1295_s27, 4  ;;  %s1487_s29 = sld [smem:[#allocation5 + %s245_s26]]  ;;  %s1489_s28 = int_to_ptr.vmem [resolvable:$true] %s241_s28 }
  0x6b   : > { %s1497_s4 = scalar_lea.hbm %s1664_s1, 1024 }
  0x6c   : > { %s754_s30 = sshll.u32 %s214_s13, 4 }
  0x6d   : > { %s216_s19 = scalar_lea.hbm %s1664_s1, %s754_s30 }
  0x6e   : > { %s1007_s21 = scalar_lea.hbm %s216_s19, 16  ;;  %p1010_p13 = scmp.lt.u32.totalorder %s216_s19, %s1664_s1 }
  0x6f   : > { %p1008_p1 = scmp.ne.s32.totalorder %s216_s19, %s1007_s21  ;;  %p1011_p4 = scmp.lt.u32.totalorder %s1497_s4, %s1007_s21 }
  0x70   : > { %p1013_p6 = scmp.lt.u32.totalorder %s1007_s21, %s216_s19 }
  0x71   : > { %p1012_p5 = por %p1011_p4, %p1010_p13 }
  0x73   : > { %p1014_p7 = por %p1013_p6, %p1012_p5 }
  0x75   : > { %p1015_p10 = pnand %p1014_p7, %p1008_p1 }
  0x77   : > { %1018 = shalt.err (!%p1015_p10)  }
  0x78   : > { %s1019_s13 = scalar_lea.vmem %s1482_s22, 16  ;;  %s1506_s2 = scalar_lea.vmem %s1482_s22, 128 }
  0x79   : > { %p1020_p11 = scmp.ne.s32.totalorder %s1482_s22, %s1019_s13  ;;  %p1024_p0 = scmp.lt.s32.totalorder %s1482_s22, %s1482_s22 }
  0x7a   : > { %p1025_p2 = scmp.lt.s32.totalorder %s1506_s2, %s1019_s13 }
  0x7c   : > { %p1026_p8 = por %p1025_p2, %p1024_p0 }
  0x7e   : > { %p1027_p3 = pnand %p1026_p8, %p1020_p11 }
  0x80   : > { %1030 = shalt.err (!%p1027_p3)  }
  0x81   : > { %227 = dma.hbm_to_vmem [thread:$0]  %s216_s19, 16, %s1482_s22, [#allocation3] }
  0x82   : > { %s755_s15 = sshll.u32 %s1484_s25, 4  ;;  %s1296_s21 = smov [#allocation2 + $0x2]  }
  0x83   : > { %s258_s26 = sshll.u32 %s1296_s21, 4  ;;  %s231_s20 = scalar_lea.hbm %s1664_s1, %s755_s15  ;;  %s1516_s26 = int_to_ptr.vmem [resolvable:$true] %s258_s26 }
  0x84   : > { %s1031_s11 = scalar_lea.hbm %s231_s20, 16  ;;  %p1034_p12 = scmp.lt.u32.totalorder %s231_s20, %s1664_s1 }
  0x85   : > { %p1032_p9 = scmp.ne.s32.totalorder %s231_s20, %s1031_s11  ;;  %p1035_p1 = scmp.lt.u32.totalorder %s1497_s4, %s1031_s11 }
  0x86   : > { %p1037_p4 = scmp.lt.u32.totalorder %s1031_s11, %s231_s20 }
  0x87   : > { %p1036_p13 = por %p1035_p1, %p1034_p12 }
  0x89   : > { %p1038_p5 = por %p1037_p4, %p1036_p13 }
  0x8b   : > { %p1039_p6 = pnand %p1038_p5, %p1032_p9 }
  0x8d   : > { %1042 = shalt.err (!%p1039_p6)  }
  0x8e   : > { %s1043_s25 = scalar_lea.vmem %s1489_s28, 16  ;;  %p1048_p10 = scmp.lt.s32.totalorder %s1489_s28, %s1482_s22 }
  0x8f   : > { %p1044_p7 = scmp.ne.s32.totalorder %s1489_s28, %s1043_s25  ;;  %p1049_p11 = scmp.lt.s32.totalorder %s1506_s2, %s1043_s25 }
  0x91   : > { %p1050_p0 = por %p1049_p11, %p1048_p10 }
  0x93   : > { %p1051_p2 = pnand %p1050_p0, %p1044_p7 }
  0x95   : > { %1054 = shalt.err (!%p1051_p2)  }
  0x96   : > { %244 = dma.hbm_to_vmem [thread:$0]  %s231_s20, 16, %s1489_s28, [#allocation3 + $0x1] }
  0x97   : > { %s756_s19 = sshll.u32 %s1487_s29, 4  ;;  %s262_s13 = sadd.s32 3, %s1474_s23 }
  0x98   : > { %s248_s27 = scalar_lea.hbm %s1664_s1, %s756_s19  ;;  %s1533_s30 = sld [smem:[#allocation5 + %s262_s13]] }
  0x99   : > { %s1055_s11 = scalar_lea.hbm %s248_s27, 16  ;;  %p1058_p3 = scmp.lt.u32.totalorder %s248_s27, %s1664_s1 }
  0x9a   : > { %p1056_p8 = scmp.ne.s32.totalorder %s248_s27, %s1055_s11  ;;  %p1059_p9 = scmp.lt.u32.totalorder %s1497_s4, %s1055_s11 }
  0x9b   : > { %p1061_p1 = scmp.lt.u32.totalorder %s1055_s11, %s248_s27 }
  0x9c   : > { %p1060_p12 = por %p1059_p9, %p1058_p3 }
  0x9e   : > { %p1062_p13 = por %p1061_p1, %p1060_p12 }
  0xa0   : > { %p1063_p4 = pnand %p1062_p13, %p1056_p8 }
  0xa2   : > { %1066 = shalt.err (!%p1063_p4)  }
  0xa3   : > { %s1067_s28 = scalar_lea.vmem %s1516_s26, 16  ;;  %p1072_p6 = scmp.lt.s32.totalorder %s1516_s26, %s1482_s22 }
  0xa4   : > { %p1068_p5 = scmp.ne.s32.totalorder %s1516_s26, %s1067_s28  ;;  %p1073_p7 = scmp.lt.s32.totalorder %s1506_s2, %s1067_s28 }
  0xa6   : > { %p1074_p10 = por %p1073_p7, %p1072_p6 }
  0xa8   : > { %p1075_p11 = pnand %p1074_p10, %p1068_p5 }
  0xaa   : > { %1078 = shalt.err (!%p1075_p11)  }
  0xab   : > { %261 = dma.hbm_to_vmem [thread:$0]  %s248_s27, 16, %s1516_s26, [#allocation3 + $0x2] }
  0xac   : > { %s279_s29 = sadd.s32 4, %s1474_s23  ;;  %s1297_s20 = smov [#allocation2 + $0x3]  }
  0xad   : > { %s275_s25 = sshll.u32 %s1297_s20, 4  ;;  %s280_s19 = sld [smem:[#allocation5 + %s279_s29]]  ;;  %s276_s25 = int_to_ptr.vmem [resolvable:$true] %s275_s25 }
  0xae   : > { %s1298_s13 = smov [#allocation2 + $0x4]   ;;  %s296_s21 = sadd.s32 5, %s1474_s23 }
  0xaf   : > { %s292_s15 = sshll.u32 %s1298_s13, 4  ;;  %s757_s11 = sshll.u32 %s1533_s30, 4  ;;  %s1548_s15 = int_to_ptr.vmem [resolvable:$true] %s292_s15 }
  0xb0   : > { %s265_s28 = scalar_lea.hbm %s1664_s1, %s757_s11  ;;  %s1553_s9 = sld [smem:[#allocation5 + %s296_s21]] }
  0xb1   : > { %s1079_s12 = scalar_lea.hbm %s265_s28, 16  ;;  %p1082_p2 = scmp.lt.u32.totalorder %s265_s28, %s1664_s1 }
  0xb2   : > { %p1080_p0 = scmp.ne.s32.totalorder %s265_s28, %s1079_s12  ;;  %p1083_p8 = scmp.lt.u32.totalorder %s1497_s4, %s1079_s12 }
  0xb3   : > { %p1085_p9 = scmp.lt.u32.totalorder %s1079_s12, %s265_s28 }
  0xb4   : > { %p1084_p3 = por %p1083_p8, %p1082_p2 }
  0xb6   : > { %p1086_p12 = por %p1085_p9, %p1084_p3 }
  0xb8   : > { %p1087_p1 = pnand %p1086_p12, %p1080_p0 }
  0xba   : > { %1090 = shalt.err (!%p1087_p1)  }
  0xbb   : > { %s1091_s30 = scalar_lea.vmem %s276_s25, 16  ;;  %p1096_p4 = scmp.lt.s32.totalorder %s276_s25, %s1482_s22 }
  0xbc   : > { %p1092_p13 = scmp.ne.s32.totalorder %s276_s25, %s1091_s30  ;;  %p1097_p5 = scmp.lt.s32.totalorder %s1506_s2, %s1091_s30 }
  0xbe   : > { %p1098_p6 = por %p1097_p5, %p1096_p4 }
  0xc0   : > { %p1099_p7 = pnand %p1098_p6, %p1092_p13 }
  0xc2   : > { %1102 = shalt.err (!%p1099_p7)  }
  0xc3   : > { %278 = dma.hbm_to_vmem [thread:$0]  %s265_s28, 16, %s276_s25, [#allocation3 + $0x3] }
  0xc4   : > { %s758_s29 = sshll.u32 %s280_s19, 4  ;;  %s1299_s12 = smov [#allocation2 + $0x5]  }
  0xc5   : > { %s282_s21 = scalar_lea.hbm %s1664_s1, %s758_s29  ;;  %s309_s11 = sshll.u32 %s1299_s12, 4  ;;  %s310_s11 = int_to_ptr.vmem [resolvable:$true] %s309_s11 }
  0xc6   : > { %s1103_s14 = scalar_lea.hbm %s282_s21, 16  ;;  %p1106_p11 = scmp.lt.u32.totalorder %s282_s21, %s1664_s1 }
  0xc7   : > { %p1104_p10 = scmp.ne.s32.totalorder %s282_s21, %s1103_s14  ;;  %p1107_p0 = scmp.lt.u32.totalorder %s1497_s4, %s1103_s14 }
  0xc8   : > { %p1109_p8 = scmp.lt.u32.totalorder %s1103_s14, %s282_s21 }
  0xc9   : > { %p1108_p2 = por %p1107_p0, %p1106_p11 }
  0xcb   : > { %p1110_p3 = por %p1109_p8, %p1108_p2 }
  0xcd   : > { %p1111_p9 = pnand %p1110_p3, %p1104_p10 }
  0xcf   : > { %1114 = shalt.err (!%p1111_p9)  }
  0xd0   : > { %s1115_s25 = scalar_lea.vmem %s1548_s15, 16  ;;  %p1120_p1 = scmp.lt.s32.totalorder %s1548_s15, %s1482_s22 }
  0xd1   : > { %p1116_p12 = scmp.ne.s32.totalorder %s1548_s15, %s1115_s25  ;;  %p1121_p13 = scmp.lt.s32.totalorder %s1506_s2, %s1115_s25 }
  0xd3   : > { %p1122_p4 = por %p1121_p13, %p1120_p1 }
  0xd5   : > { %p1123_p5 = pnand %p1122_p4, %p1116_p12 }
  0xd7   : > { %1126 = shalt.err (!%p1123_p5)  }
  0xd8   : > { %295 = dma.hbm_to_vmem [thread:$0]  %s282_s21, 16, %s1548_s15, [#allocation3 + $0x4] }
  0xd9   : > { %s313_s19 = sadd.s32 6, %s1474_s23  ;;  %s759_s28 = sshll.u32 %s1553_s9, 4 }
  0xda   : > { %s314_s27 = sld [smem:[#allocation5 + %s313_s19]]  ;;  %s299_s20 = scalar_lea.hbm %s1664_s1, %s759_s28 }
  0xdb   : > { %s1127_s13 = scalar_lea.hbm %s299_s20, 16  ;;  %p1130_p7 = scmp.lt.u32.totalorder %s299_s20, %s1664_s1 }
  0xdc   : > { %p1128_p6 = scmp.ne.s32.totalorder %s299_s20, %s1127_s13  ;;  %p1131_p10 = scmp.lt.u32.totalorder %s1497_s4, %s1127_s13 }
  0xdd   : > { %p1133_p0 = scmp.lt.u32.totalorder %s1127_s13, %s299_s20 }
  0xde   : > { %p1132_p11 = por %p1131_p10, %p1130_p7 }
  0xe0   : > { %p1134_p2 = por %p1133_p0, %p1132_p11 }
  0xe2   : > { %p1135_p8 = pnand %p1134_p2, %p1128_p6 }
  0xe4   : > { %1138 = shalt.err (!%p1135_p8)  }
  0xe5   : > { %s1139_s15 = scalar_lea.vmem %s310_s11, 16  ;;  %p1144_p9 = scmp.lt.s32.totalorder %s310_s11, %s1482_s22 }
  0xe6   : > { %p1140_p3 = scmp.ne.s32.totalorder %s310_s11, %s1139_s15  ;;  %p1145_p12 = scmp.lt.s32.totalorder %s1506_s2, %s1139_s15 }
  0xe8   : > { %p1146_p1 = por %p1145_p12, %p1144_p9 }
  0xea   : > { %p1147_p13 = pnand %p1146_p1, %p1140_p3 }
  0xec   : > { %1150 = shalt.err (!%p1147_p13)  }
  0xed   : > { %312 = dma.hbm_to_vmem [thread:$0]  %s299_s20, 16, %s310_s11, [#allocation3 + $0x5] }
  0xee   : > { %s1300_s9 = smov [#allocation2 + $0x6]   ;;  %s330_s24 = sadd.s32 7, %s1474_s23 }
  0xef   : > { %s326_s21 = sshll.u32 %s1300_s9, 4  ;;  %s331_s26 = sld [smem:[#allocation5 + %s330_s24]]  ;;  %s327_s21 = int_to_ptr.vmem [resolvable:$true] %s326_s21 }
  0xf0   : > { %s760_s25 = sshll.u32 %s314_s27, 4  ;;  %s1301_s19 = smov [#allocation2 + $0x7]  }
  0xf1   : > { %s343_s28 = sshll.u32 %s1301_s19, 4  ;;  %s316_s13 = scalar_lea.hbm %s1664_s1, %s760_s25  ;;  %s344_s28 = int_to_ptr.vmem [resolvable:$true] %s343_s28 }
  0xf2   : > { %s1151_s12 = scalar_lea.hbm %s316_s13, 16  ;;  %p1154_p5 = scmp.lt.u32.totalorder %s316_s13, %s1664_s1 }
  0xf3   : > { %p1152_p4 = scmp.ne.s32.totalorder %s316_s13, %s1151_s12  ;;  %p1155_p6 = scmp.lt.u32.totalorder %s1497_s4, %s1151_s12 }
  0xf4   : > { %p1157_p10 = scmp.lt.u32.totalorder %s1151_s12, %s316_s13 }
  0xf5   : > { %p1156_p7 = por %p1155_p6, %p1154_p5 }
  0xf7   : > { %p1158_p11 = por %p1157_p10, %p1156_p7 }
  0xf9   : > { %p1159_p0 = pnand %p1158_p11, %p1152_p4 }
  0xfb   : > { %1162 = shalt.err (!%p1159_p0)  }
  0xfc   : > { %s1163_s23 = scalar_lea.vmem %s327_s21, 16  ;;  %p1168_p8 = scmp.lt.s32.totalorder %s327_s21, %s1482_s22 }
  0xfd   : > { %p1164_p2 = scmp.ne.s32.totalorder %s327_s21, %s1163_s23  ;;  %p1169_p3 = scmp.lt.s32.totalorder %s1506_s2, %s1163_s23 }
  0xff   : > { %p1170_p9 = por %p1169_p3, %p1168_p8 }
 0x101   : > { %p1171_p12 = pnand %p1170_p9, %p1164_p2 }
 0x103   : > { %1174 = shalt.err (!%p1171_p12)  }
 0x104   : > { %329 = dma.hbm_to_vmem [thread:$0]  %s316_s13, 16, %s327_s21, [#allocation3 + $0x6] }
 0x105   : > { %s761_s11 = sshll.u32 %s331_s26, 4 }
 0x106   : > { %s333_s9 = scalar_lea.hbm %s1664_s1, %s761_s11 }
 0x107   : > { %s1175_s24 = scalar_lea.hbm %s333_s9, 16  ;;  %p1178_p13 = scmp.lt.u32.totalorder %s333_s9, %s1664_s1 }
 0x108   : > { %p1176_p1 = scmp.ne.s32.totalorder %s333_s9, %s1175_s24  ;;  %p1179_p4 = scmp.lt.u32.totalorder %s1497_s4, %s1175_s24 }
 0x109   : > { %p1181_p6 = scmp.lt.u32.totalorder %s1175_s24, %s333_s9 }
 0x10a   : > { %p1180_p5 = por %p1179_p4, %p1178_p13 }
 0x10c   : > { %p1182_p7 = por %p1181_p6, %p1180_p5 }
 0x10e   : > { %p1183_p10 = pnand %p1182_p7, %p1176_p1 }
 0x110   : > { %1186 = shalt.err (!%p1183_p10)  }
 0x111   : > { %s1187_s21 = scalar_lea.vmem %s344_s28, 16  ;;  %p1192_p0 = scmp.lt.s32.totalorder %s344_s28, %s1482_s22 }
 0x112   : > { %p1188_p11 = scmp.ne.s32.totalorder %s344_s28, %s1187_s21  ;;  %p1193_p2 = scmp.lt.s32.totalorder %s1506_s2, %s1187_s21 }
 0x114   : > { %p1194_p8 = por %p1193_p2, %p1192_p0 }
 0x116   : > { %p1195_p3 = pnand %p1194_p8, %p1188_p11 }
 0x118   : > { %1198 = shalt.err (!%p1195_p3)  }
 0x119   : > { %346 = dma.hbm_to_vmem [thread:$0]  %s333_s9, 16, %s344_s28, [#allocation3 + $0x7] }
 0x11a   : > { %s211_s26 = scalar_lea.vmem [#allocation11], %s1478_s18 }
 0x11b   : > { %1253 = dma.done.wait [#allocation3], 16 }
 0x11c   : > { %1254 = vsyncadd [#allocation3], 4294967280 }
 0x11d   : > { %1255 = dma.done.wait [#allocation3 + $0x1], 16 }
 0x11e   : > { %1256 = vsyncadd [#allocation3 + $0x1], 4294967280 }
 0x11f   : > { %1257 = dma.done.wait [#allocation3 + $0x2], 16 }
 0x120   : > { %1258 = vsyncadd [#allocation3 + $0x2], 4294967280 }
 0x121   : > { %1259 = dma.done.wait [#allocation3 + $0x3], 16 }
 0x122   : > { %1260 = vsyncadd [#allocation3 + $0x3], 4294967280 }
 0x123   : > { %1261 = dma.done.wait [#allocation3 + $0x4], 16 }
 0x124   : > { %1262 = vsyncadd [#allocation3 + $0x4], 4294967280 }
 0x125   : > { %1263 = dma.done.wait [#allocation3 + $0x5], 16 }
 0x126   : > { %1264 = vsyncadd [#allocation3 + $0x5], 4294967280 }
 0x127   : > { %1265 = dma.done.wait [#allocation3 + $0x6], 16 }
 0x128   : > { %1266 = vsyncadd [#allocation3 + $0x6], 4294967280 }
 0x129   : > { %1267 = dma.done.wait [#allocation3 + $0x7], 16 }
 0x12a   : > { %1268 = vsyncadd [#allocation3 + $0x7], 4294967280  ;;  %v1302_v0 = vmov 0.0   ;;  %vm1303_vm0 = vmmov 0   ;;  %v923_v1 = vld [vmem:[#allocation6] sm:$0xff]   ;;  %v924_v2 = vld [vmem:[#allocation6 + $0x8] sm:$0xff]  }
 0x12b   : > { %810 = vmatprep.subr.bf16.mxu0 %v1302_v0  ;;  %826 = vmatprep.mubr.msk.bf16.mxu0 %vm1303_vm0, %v1302_v0  ;;  %v925_v3 = vld [vmem:[#allocation6 + $0x10] sm:$0xff]   ;;  %v931_v4 = vld [vmem:[#allocation9] sm:$0xff]   ;;  %v926_v5 = vld [vmem:[#allocation6 + $0x18] sm:$0xff]   ;;  %s781_s30 = sshll.u32 %s1373_s0, 7  ;;  %s605_s29 = sshll.u32 %s211_s26, 4  ;;  %s1619_s29 = int_to_ptr.vmem [resolvable:$true] %s605_s29 }
 0x12c   : > { %830 = vmatprep.subr.bf16.mxu1 %v1302_v0  ;;  %846 = vmatprep.mubr.msk.bf16.mxu1 %vm1303_vm0, %v1302_v0  ;;  %v932_v6 = vld [vmem:[#allocation9 + $0x8] sm:$0xff]   ;;  %v927_v7 = vld [vmem:[#allocation6 + $0x20] sm:$0xff]   ;;  %v933_v8 = vld [vmem:[#allocation9 + $0x10] sm:$0xff]   ;;  %s1617_s14 = scalar_lea.hbm %s1669_s6, %s781_s30  ;;  %s1693_s0 = sand.u32 1, %s1279_s8  }
 0x12d   : > { %811 = vmatpush3.bf16.msra.mxu0 %v923_v1  ;;  %831 = vmatpush3.bf16.msra.mxu1 %v931_v4  ;;  %v928_v9 = vld [vmem:[#allocation6 + $0x28] sm:$0xff]   ;;  %v934_v10 = vld [vmem:[#allocation9 + $0x18] sm:$0xff]   ;;  %v929_v11 = vld [vmem:[#allocation6 + $0x30] sm:$0xff]   ;;  %s592_s15 = scalar_lea.sflag [#allocation8], %s1693_s0  ;;  %s1199_s23 = scalar_lea.vmem %s1619_s29, 128 }
 0x12e   : > { %812 = vmatprep.subr.bf16.mxu0 %v1302_v0  ;;  %832 = vmatprep.subr.bf16.mxu1 %v1302_v0  ;;  %v930_v12 = vld [vmem:[#allocation6 + $0x38] sm:$0xff]   ;;  %v935_v15 = vld [vmem:[#allocation9 + $0x20] sm:$0xff]   ;;  %v936_v16 = vld [vmem:[#allocation9 + $0x28] sm:$0xff]   ;;  %p1200_p9 = scmp.ne.s32.totalorder %s1619_s29, %s1199_s23  ;;  %p1694_p12 = scmp.ne.s32.totalorder %s1682_s16, 0 }
 0x12f   : > { %v364_v13 = vld [vmem:[#allocation2] sm:$0xff]  ;;  %v937_v17 = vld [vmem:[#allocation9 + $0x30] sm:$0xff]   ;;  %s1304_s11 = smov [#allocation11]  }
 0x130   : > { %v365_v14 = vpack.c.bf16 %v364_v13, %v364_v13  ;;  %v938_v18 = vld [vmem:[#allocation9 + $0x38] sm:$0xff]   ;;  %p1201_p1 = pnand %p1200_p9, %p1694_p12  ;;  %s1203_s27 = sshll.u32 %s1304_s11, 4  ;;  %s1204_s27 = int_to_ptr.vmem [resolvable:$false] %s1203_s27 }
 0x131   : > { %813 = vmatpush3.bf16.msra.mxu0 %v924_v2  ;;  %833 = vmatpush3.bf16.msra.mxu1 %v932_v6  ;;  %v762_v19 = vld [vmem:[%s1666_s3] ss:$0 sm:$0xff]  ;;  %s1205_s20 = scalar_lea.vmem %s1204_s27, 256  ;;  %p1206_p4 = scmp.lt.s32.totalorder %s1619_s29, %s1204_s27 }
 0x132   : > { %814 = vmatprep.subr.bf16.mxu0 %v1302_v0  ;;  %834 = vmatprep.subr.bf16.mxu1 %v1302_v0  ;;  %v771_v27 = vld [vmem:[%s1668_s5] ss:$0 sm:$0xff]  ;;  %p1202_p13 = pneg %p1201_p1  ;;  %p1207_p5 = scmp.lt.s32.totalorder %s1205_s20, %s1199_s23 }
 0x134   : > { %p1208_p6 = por %p1207_p5, %p1206_p4 }
 0x135   : > { %815 = vmatpush3.bf16.msra.mxu0 %v925_v3  ;;  %835 = vmatpush3.bf16.msra.mxu1 %v933_v8 }
 0x136   : > { %816 = vmatprep.subr.bf16.mxu0 %v1302_v0  ;;  %836 = vmatprep.subr.bf16.mxu1 %v1302_v0  ;;  %p1209_p7 = pnand %p1208_p6, %p1202_p13 }
 0x139   : > { %817 = vmatpush3.bf16.msra.mxu0 %v926_v5  ;;  %837 = vmatpush3.bf16.msra.mxu1 %v934_v10 }
 0x13a   : > { %818 = vmatprep.subr.bf16.mxu0 %v1302_v0  ;;  %838 = vmatprep.subr.bf16.mxu1 %v1302_v0 }
 0x13d   : > { %819 = vmatpush3.bf16.msra.mxu0 %v927_v7  ;;  %839 = vmatpush3.bf16.msra.mxu1 %v935_v15 }
 0x13e   : > { %820 = vmatprep.subr.bf16.mxu0 %v1302_v0  ;;  %840 = vmatprep.subr.bf16.mxu1 %v1302_v0 }
 0x141   : > { %821 = vmatpush3.bf16.msra.mxu0 %v928_v9  ;;  %841 = vmatpush3.bf16.msra.mxu1 %v936_v16 }
 0x142   : > { %822 = vmatprep.subr.bf16.mxu0 %v1302_v0  ;;  %842 = vmatprep.subr.bf16.mxu1 %v1302_v0 }
 0x145   : > { %823 = vmatpush3.bf16.msra.mxu0 %v929_v11  ;;  %843 = vmatpush3.bf16.msra.mxu1 %v937_v17 }
 0x146   : > { %824 = vmatprep.subr.bf16.mxu0 %v1302_v0  ;;  %844 = vmatprep.subr.bf16.mxu1 %v1302_v0 }
 0x149   : > { %825 = vmatpush3.bf16.msra.mxu0 %v930_v12  ;;  %845 = vmatpush3.bf16.msra.mxu1 %v938_v18 }
 0x14c   : > { %827 = vmatmul.mubr.bf16.vlgmr.msra.gmra.mrb[0].mxu0 %v365_v14 }
 0x21f   : > { %v471_v20 = vpop.f32.mrb[0].mxu0 }
 0x220   : > { %v472_v21 = vadd.f32 %v762_v19, %v471_v20  ;;  %v828_v22 = vpop.f32.mrb[1].mxu0 }
 0x221   : > { %v474_v23 = vpop.f32.mrb[2].mxu0 }
 0x222   : > { %939 = vtanh.f32 %v472_v21  ;;  %v829_v24 = vpop.f32.mrb[3].mxu0 }
 0x22c   : > { %v940_v25 = vpop.eup %939 }
 0x22d   : > { %v478_v26 = vpack.c.bf16 %v940_v25, %v940_v25 }
 0x22f   : > { %847 = vmatmul.mubr.bf16.vlgmr.msra.gmra.mrb[0].mxu1 %v478_v26 }
 0x302   : > { %v584_v28 = vpop.f32.mrb[0].mxu1 }
 0x303   : > { %v585_v29 = vadd.f32 %v771_v27, %v584_v28  ;;  %v848_v30 = vpop.f32.mrb[1].mxu1 }
 0x304   : > { %v587_v31 = vpop.f32.mrb[2].mxu1 }
 0x305   : > { %590 = vst [vmem:[%s211_s26] sm:$0xff] %v585_v29  ;;  %v849_v32 = vpop.f32.mrb[3].mxu1 }
 0x306   : > { %1212 = shalt.err (!%p1209_p7)
}
 0x307   : > { %s1213_s18 = scalar_lea.hbm %s1617_s14, 128  ;;  %s1217_s25 = scalar_lea.hbm %s1669_s6, 256 }
 0x308   : > { %p1214_p10 = scmp.ne.s32.totalorder %s1617_s14, %s1213_s18  ;;  %p1218_p2 = scmp.lt.u32.totalorder %s1617_s14, %s1669_s6 }
 0x309   : > { %p1219_p8 = scmp.lt.u32.totalorder %s1217_s25, %s1213_s18  ;;  %p1221_p9 = scmp.lt.u32.totalorder %s1213_s18, %s1617_s14 }
 0x30a   : > { %p1215_p11 = pnand %p1214_p10, %p1694_p12 }
 0x30b   : > { %p1220_p3 = por %p1219_p8, %p1218_p2 }
 0x30c   : > { %p1216_p0 = pneg %p1215_p11 }
 0x30d   : > { %p1222_p1 = por %p1221_p9, %p1220_p3 }
 0x30f   : > { %p1223_p13 = pnand %p1222_p1, %p1216_p0 }
 0x311   : > { %1226 = shalt.err (!%p1223_p13)
}
 0x312   : > { %858 = dma.vmem_to_hbm [thread:$0]  (%p1694_p12), %s1619_s29, 128, %s1617_s14, %s592_s15  }
 0x313 PF: > { %p875_p4 = scmp.ge.s32.totalorder %s1287_s10, 2  ;;  %s617_s26 = sand.u32 1, %s1275_s7  }
 0x314   : > { %p1695_p5 = scmp.ne.s32.totalorder %s1683_s17, 0  ;;  %s618_s4 = scalar_lea.sflag [#allocation8], %s617_s26 }
 0x316   : > { %p868_p6 = pnand %p875_p4, %p1695_p5 }
 0x318   : > { %1270 = dma.done.wait (!%p868_p6), %s618_s4, 128  }
 0x319   : > { %1272 = vsyncadd (!%p868_p6), %s618_s4, 4294967168  ;;  %s1696_s10 = sld [smem:[#allocation43_spill]]  ;;  %s1697_s22 = sld [smem:[#allocation42_spill]] }
 0x31a   : > { %s1698_s9 = sld [smem:[#allocation44_spill]]  ;;  %s1699_s7 = smov %s1279_s8 }
 0x31f   : > { %p22_p7 = scmp.ge.s32.totalorder %s1696_s10, 4   ;;  %s1700_s8 = smov %s1697_s22 }
 0x321   :  { %24 = sbr.rel (!%p22_p7) target bundleno = 18 (0x12), region = 138 }
 0x328   :  { %623 = vsyncpa [#allocation7], 1 }
 0x329   :  { %625 = vsyncpa [#allocation7 + $0x1], 1 }
 0x32a   :  { %626 = vsyncpa [#allocation10], 1 }
 0x32b   :  { %627 = vsyncpa [#allocation8], 1 }
 0x32c   :  { %629 = vsyncpa [#allocation8 + $0x1], 1 }
 0x32d   :  { %630 = vsyncmov [#allocation3] }
 0x330   :  { %s631_s16 = vpop.sfrf %630 }
 0x331   :  { %p784_p12 = scmp.ne.s32.totalorder %s631_s16, 0 }
 0x333   :  { %635 = shalt.err (%p784_p12)  }
 0x334   :  { %637 = vsyncmov [#allocation3 + $0x1] }
 0x337   :  { %s638_s17 = vpop.sfrf %637 }
 0x338   :  { %p785_p10 = scmp.ne.s32.totalorder %s638_s17, 0 }
 0x33a   :  { %642 = shalt.err (%p785_p10)  }
 0x33b   :  { %644 = vsyncmov [#allocation3 + $0x2] }
 0x33e   :  { %s645_s2 = vpop.sfrf %644 }
 0x33f   :  { %p786_p11 = scmp.ne.s32.totalorder %s645_s2, 0 }
 0x341   :  { %649 = shalt.err (%p786_p11)  }
 0x342   :  { %651 = vsyncmov [#allocation3 + $0x3] }
 0x345   :  { %s652_s10 = vpop.sfrf %651 }
 0x346   :  { %p787_p0 = scmp.ne.s32.totalorder %s652_s10, 0 }
 0x348   :  { %656 = shalt.err (%p787_p0)  }
 0x349   :  { %658 = vsyncmov [#allocation3 + $0x4] }
 0x34c   :  { %s659_s1 = vpop.sfrf %658 }
 0x34d   :  { %p788_p2 = scmp.ne.s32.totalorder %s659_s1, 0 }
 0x34f   :  { %663 = shalt.err (%p788_p2)  }
 0x350   :  { %665 = vsyncmov [#allocation3 + $0x5] }
 0x353   :  { %s666_s3 = vpop.sfrf %665 }
 0x354   :  { %p789_p8 = scmp.ne.s32.totalorder %s666_s3, 0 }
 0x356   :  { %670 = shalt.err (%p789_p8)  }
 0x357   :  { %672 = vsyncmov [#allocation3 + $0x6] }
 0x35a   :  { %s673_s5 = vpop.sfrf %672 }
 0x35b   :  { %p790_p3 = scmp.ne.s32.totalorder %s673_s5, 0 }
 0x35d   :  { %677 = shalt.err (%p790_p3)  }
 0x35e   :  { %679 = vsyncmov [#allocation3 + $0x7] }
 0x361   :  { %s680_s6 = vpop.sfrf %679 }
 0x362   :  { %p791_p9 = scmp.ne.s32.totalorder %s680_s6, 0 }
 0x364   :  { %684 = shalt.err (%p791_p9)  }

</bundles_post_ra>
